<compile_context>
chip_gen: v7x
topology: tpu7x:2x2x1
jax: 0.10.0
libtpu: 0.0.40
codegen_flags: <defaults>
</compile_context>

<pallas_src>
import functools
import math

import jax
import jax.numpy as jnp
from jax.experimental import pallas as pl
from jax.experimental.pallas import tpu as pltpu


def _round_up(x: int, m: int) -> int:
    return (x + m - 1) // m * m


def mlp_kernel(x_ref, w1_ref, b1_ref, w2_ref, b2_ref, o_ref, *, n_chunks, chunk):
    # Cast activations to bf16 in-kernel (saves a full wrapper pass over x).
    x = x_ref[...].astype(w1_ref.dtype)
    acc = jnp.zeros(o_ref.shape, jnp.float32)
    # Hidden-dim chunking: fc2 of chunk c overlaps the ReLU/cast of chunk c+1,
    # and the f32 intermediate is only (tm, chunk).  Static slice bounds ->
    # zero-cost views, unrolled at trace time.
    for c in range(n_chunks):
        lo = c * chunk
        h = jnp.dot(x, w1_ref[:, lo:lo + chunk],
                    preferred_element_type=jnp.float32)
        h = jnp.maximum(h + b1_ref[:, lo:lo + chunk], 0.0)   # bias + ReLU (f32 VPU)
        # dropout (eval mode) = identity
        acc = acc + jnp.dot(h.astype(w2_ref.dtype), w2_ref[lo:lo + chunk, :],
                            preferred_element_type=jnp.float32)
    o_ref[...] = (acc + b2_ref[...]).astype(o_ref.dtype)


def prepare_weights(w1, b1, w2, b2, compute_dtype=jnp.bfloat16):
    """One-time weight prep: lane-dense zero-padding to multiples of 128 and
    bf16 cast.  Hoisted out of the per-call hot path so the full f32 weights
    are not re-read / re-written from HBM on every forward call."""
    E, H = w1.shape
    E_p, H_p = _round_up(E, 128), _round_up(H, 128)
    w1_p = jnp.pad(w1, ((0, E_p - E), (0, H_p - H))).astype(compute_dtype)
    w2_p = jnp.pad(w2, ((0, H_p - H), (0, E_p - E))).astype(compute_dtype)
    b1_p = jnp.pad(b1, (0, H_p - H)).reshape(1, H_p).astype(jnp.float32)
    b2_p = jnp.pad(b2, (0, E_p - E)).reshape(1, E_p).astype(jnp.float32)
    return w1_p, b1_p, w2_p, b2_p


def _derive_config(M, E, H, x_itemsize, tm=None):
    """Static (Python-level) tiling / VMEM config."""
    E_p, H_p = _round_up(E, 128), _round_up(H, 128)
    # In-kernel hidden-dim chunk: a multiple of 128 that divides H_p.
    chunk = 512 if H_p % 512 == 0 else (256 if H_p % 256 == 0 else 128)
    n_chunks = H_p // chunk

    # Physical VMEM per TensorCore (64 MiB on v7x, 128 MiB on v5e/v6e).
    try:
        vmem_cap = int(pltpu.get_tpu_info().vmem_capacity_bytes)
    except Exception:
        vmem_cap = 64 * 1024 * 1024   # conservative (v7x-sized) fallback
    budget = vmem_cap - 8 * 1024 * 1024

    bf16, f32 = 2, 4
    weight_bytes = 2 * E_p * H_p * bf16          # W1 + W2, single-buffered bf16
    bias_bytes = (H_p + E_p) * f32
    # Per-row bytes of one tile: double-buffered x / out tiles, f32 output
    # accumulator, f32 + bf16 hidden chunk.
    per_row = E_p * (2 * x_itemsize + 2 * x_itemsize + f32) + chunk * (f32 + bf16)
    avail = budget - weight_bytes - bias_bytes

    if tm is None:
        # VMEM-derived row-tile cap (up to 512 on the 128 MiB parts).
        tm_cap = max(64, min(512, (avail // max(per_row, 1)) // 8 * 8))
        tm_fit = _round_up(max(M, 1), 8)
        if tm_fit <= tm_cap:
            # All rows fit in one tile; split into two tiles when there is
            # enough work so ('parallel',) can shard across v7x's two TCs.
            tm = _round_up((M + 1) // 2, 8) if M >= 256 else tm_fit
        else:
            tm = tm_cap
    tm = max(8, _round_up(int(tm), 8))

    vmem_needed = weight_bytes + bias_bytes + tm * per_row
    vmem_limit = int(min(budget, max(vmem_needed + 4 * 1024 * 1024,
                                     32 * 1024 * 1024)))
    return dict(tm=tm, chunk=chunk, n_chunks=n_chunks, vmem_limit=vmem_limit)


@functools.partial(jax.jit, static_argnames=("tm", "chunk", "n_chunks",
                                             "vmem_limit",
                                             "single_buffer_weights"))
def _mlp_call(x, w1_p, b1_p, w2_p, b2_p, *, tm, chunk, n_chunks, vmem_limit,
              single_buffer_weights):
    orig_shape = x.shape
    out_dtype = x.dtype
    E = orig_shape[-1]
    E_p, H_p = w1_p.shape
    x2d = x.reshape(-1, E)
    M = x2d.shape[0]
    M_p = _round_up(M, tm)
    if M_p != M or E_p != E:
        x2d = jnp.pad(x2d, ((0, M_p - M), (0, E_p - E)))

    def _resident(shape):
        # Constant index_map -> fetched once; single-buffer when supported.
        if single_buffer_weights:
            return pl.BlockSpec(shape, lambda i: (0, 0),
                                pipeline_mode=pl.Buffered(1))
        return pl.BlockSpec(shape, lambda i: (0, 0))

    kernel = functools.partial(mlp_kernel, n_chunks=n_chunks, chunk=chunk)
    out = pl.pallas_call(
        kernel,
        out_shape=jax.ShapeDtypeStruct((M_p, E_p), out_dtype),
        grid_spec=pltpu.PrefetchScalarGridSpec(
            num_scalar_prefetch=0,
            grid=(M_p // tm,),                                # exact, no tail
            in_specs=[
                pl.BlockSpec((tm, E_p), lambda i: (i, 0)),    # x tile (pipelined)
                _resident((E_p, H_p)),                        # W1 (resident)
                _resident((1, H_p)),                          # b1
                _resident((H_p, E_p)),                        # W2 (resident)
                _resident((1, E_p)),                          # b2
            ],
            out_specs=pl.BlockSpec((tm, E_p), lambda i: (i, 0)),
        ),
        compiler_params=pltpu.CompilerParams(
            dimension_semantics=("parallel",),
            vmem_limit_bytes=vmem_limit,
        ),
    )(x2d, w1_p, b1_p, w2_p, b2_p)

    if M_p != M or E_p != E:
        out = out[:M, :E]
    return out.reshape(orig_shape)


def mlp_layer(x, w1_p, b1_p, w2_p, b2_p, *, tm=None):
    """x: (..., E).  Weights/biases must come from prepare_weights()."""
    E = x.shape[-1]
    H_p = w1_p.shape[1]                 # already padded; round_up is idempotent
    M = math.prod(x.shape[:-1])
    cfg = _derive_config(M, E, H_p, jnp.dtype(x.dtype).itemsize, tm=tm)
    try:
        return _mlp_call(x, w1_p, b1_p, w2_p, b2_p,
                         single_buffer_weights=True, **cfg)
    except Exception:
        # Fallback if this JAX build rejects pl.Buffered(1) on pallas_call specs.
        return _mlp_call(x, w1_p, b1_p, w2_p, b2_p,
                         single_buffer_weights=False, **cfg)


if __name__ == "__main__":
    # Small shapes consistent with the module: batch=2, seq=8, embed_dim=32, hidden=64
    batch, seq, embed_dim, hidden_layer = 2, 8, 32, 64
    dropout_p = 0.1  # eval-mode forward: dropout is identity

    key = jax.random.PRNGKey(0)
    kx, kw1, kb1, kw2, kb2 = jax.random.split(key, 5)

    x = jax.random.normal(kx, (batch, seq, embed_dim), dtype=jnp.float32)

    # PyTorch nn.Linear stores weight as (out, in); generate in that shape and
    # pre-transpose to (in, out) for the kernel.
    w1_pt = jax.random.normal(kw1, (hidden_layer, embed_dim), jnp.float32) * 0.05
    b1 = jax.random.normal(kb1, (hidden_layer,), jnp.float32) * 0.05
    w2_pt = jax.random.normal(kw2, (embed_dim, hidden_layer), jnp.float32) * 0.05
    b2 = jax.random.normal(kb2, (embed_dim,), jnp.float32) * 0.05

    w1 = w1_pt.T  # (E, H)
    w2 = w2_pt.T  # (H, E)

    # One-time weight prep (padding + bf16 cast hoisted out of the hot path).
    w1_p, b1_p, w2_p, b2_p = prepare_weights(w1, b1, w2, b2)

    out = mlp_layer(x, w1_p, b1_p, w2_p, b2_p)
    out = jax.block_until_ready(out)

    # f32 reference (PyTorch eval-mode forward); loose tolerance absorbs the
    # bf16 MXU input rounding.
    ref_f32 = jnp.maximum(x @ w1 + b1, 0.0) @ w2 + b2
    assert out.shape == x.shape
    assert jnp.allclose(out, ref_f32, atol=2e-2, rtol=2e-2)

    # Tighter check against a bf16-matched reference (same casts as kernel).
    xb = x.astype(jnp.bfloat16)
    h_ref = jnp.maximum(jnp.dot(xb, w1.astype(jnp.bfloat16),
                                preferred_element_type=jnp.float32) + b1, 0.0)
    ref_bf16 = jnp.dot(h_ref.astype(jnp.bfloat16), w2.astype(jnp.bfloat16),
                       preferred_element_type=jnp.float32) + b2
    assert jnp.allclose(out, ref_bf16, atol=2e-3, rtol=2e-3)

    print("KERNEL_OK")
</pallas_src>

<mosaic_0001>
module attributes {stable_mosaic.version = 11 : i64} {
  func.func @mlp_kernel(%arg0: i32, %arg1: memref<16x128xf32, #tpu.memory_space<vmem>>, %arg2: memref<128x128xbf16, #tpu.memory_space<vmem>>, %arg3: memref<1x128xf32, #tpu.memory_space<vmem>>, %arg4: memref<128x128xbf16, #tpu.memory_space<vmem>>, %arg5: memref<1x128xf32, #tpu.memory_space<vmem>>, %arg6: memref<16x128xf32, #tpu.memory_space<vmem>>) attributes {dimension_semantics = [#tpu.dimension_semantics<parallel>], iteration_bounds = array<i64: 1>, scalar_prefetch = 0 : i64, scratch_operands = 0 : i64, tpu.core_type = #tpu.core_type<tc>, window_params = [{transform_indices = @transform_0, window_bounds = array<i64: 16, 128>}, {pipeline_mode = #tpu.pipeline_mode<synchronous>, transform_indices = @transform_1, window_bounds = array<i64: 128, 128>}, {pipeline_mode = #tpu.pipeline_mode<synchronous>, transform_indices = @transform_2, window_bounds = array<i64: 1, 128>}, {pipeline_mode = #tpu.pipeline_mode<synchronous>, transform_indices = @transform_3, window_bounds = array<i64: 128, 128>}, {pipeline_mode = #tpu.pipeline_mode<synchronous>, transform_indices = @transform_4, window_bounds = array<i64: 1, 128>}, {transform_indices = @transform_5, window_bounds = array<i64: 16, 128>}]} {
    %c0 = arith.constant 0 : index
    %c0_0 = arith.constant 0 : index
    %0 = vector.load %arg1[%c0, %c0_0] : memref<16x128xf32, #tpu.memory_space<vmem>>, vector<16x128xf32>
    %1 = arith.truncf %0 : vector<16x128xf32> to vector<16x128xbf16>
    %cst = arith.constant 0.000000e+00 : f32
    %2 = vector.broadcast %cst : f32 to vector<16x128xf32>
    %c0_1 = arith.constant 0 : index
    %c0_2 = arith.constant 0 : index
    %3 = vector.load %arg2[%c0_1, %c0_2] : memref<128x128xbf16, #tpu.memory_space<vmem>>, vector<128x128xbf16>
    %cst_3 = arith.constant dense<0.000000e+00> : vector<16x128xf32>
    %4 = tpu.matmul %1, %3, %cst_3 {dimension_numbers = #tpu.dot_dimension_numbers<[1], [0], [0], [1], [0, 0, 1, 1], [], []>} : vector<16x128xbf16>, vector<128x128xbf16>, vector<16x128xf32> -> vector<16x128xf32>
    %c0_4 = arith.constant 0 : index
    %c0_5 = arith.constant 0 : index
    %5 = vector.load %arg3[%c0_4, %c0_5] : memref<1x128xf32, #tpu.memory_space<vmem>>, vector<1x128xf32>
    %6 = vector.broadcast %5 : vector<1x128xf32> to vector<16x128xf32>
    %7 = arith.addf %4, %6 : vector<16x128xf32>
    %cst_6 = arith.constant 0.000000e+00 : f32
    %8 = vector.broadcast %cst_6 : f32 to vector<16x128xf32>
    %9 = arith.maximumf %7, %8 : vector<16x128xf32>
    %10 = arith.truncf %9 : vector<16x128xf32> to vector<16x128xbf16>
    %c0_7 = arith.constant 0 : index
    %c0_8 = arith.constant 0 : index
    %11 = vector.load %arg4[%c0_7, %c0_8] : memref<128x128xbf16, #tpu.memory_space<vmem>>, vector<128x128xbf16>
    %cst_9 = arith.constant dense<0.000000e+00> : vector<16x128xf32>
    %12 = tpu.matmul %10, %11, %cst_9 {dimension_numbers = #tpu.dot_dimension_numbers<[1], [0], [0], [1], [0, 0, 1, 1], [], []>} : vector<16x128xbf16>, vector<128x128xbf16>, vector<16x128xf32> -> vector<16x128xf32>
    %13 = arith.addf %2, %12 : vector<16x128xf32>
    %c0_10 = arith.constant 0 : index
    %c0_11 = arith.constant 0 : index
    %14 = vector.load %arg5[%c0_10, %c0_11] : memref<1x128xf32, #tpu.memory_space<vmem>>, vector<1x128xf32>
    %15 = vector.broadcast %14 : vector<1x128xf32> to vector<16x128xf32>
    %16 = arith.addf %13, %15 : vector<16x128xf32>
    %c0_12 = arith.constant 0 : index
    %c0_13 = arith.constant 0 : index
    %17 = vector.load %arg6[%c0_12, %c0_13] : memref<16x128xf32, #tpu.memory_space<vmem>>, vector<16x128xf32>
    tpu.vector_store %arg6[%c0_12, %c0_13], %16 {strides = array<i32>} : memref<16x128xf32, #tpu.memory_space<vmem>>, vector<16x128xf32>,
    return
  }
  func.func @transform_0(%arg0: i32) -> (i32, i32) {
    %c0_i32 = arith.constant 0 : i32
    %c0_i32_0 = arith.constant 0 : i32
    return %arg0, %c0_i32 : i32, i32
  }
  func.func @transform_1(%arg0: i32) -> (i32, i32) {
    %c0_i32 = arith.constant 0 : i32
    %c0_i32_0 = arith.constant 0 : i32
    %c0_i32_1 = arith.constant 0 : i32
    return %c0_i32, %c0_i32_0 : i32, i32
  }
  func.func @transform_2(%arg0: i32) -> (i32, i32) {
    %c0_i32 = arith.constant 0 : i32
    %c0_i32_0 = arith.constant 0 : i32
    %c0_i32_1 = arith.constant 0 : i32
    return %c0_i32, %c0_i32_0 : i32, i32
  }
  func.func @transform_3(%arg0: i32) -> (i32, i32) {
    %c0_i32 = arith.constant 0 : i32
    %c0_i32_0 = arith.constant 0 : i32
    %c0_i32_1 = arith.constant 0 : i32
    return %c0_i32, %c0_i32_0 : i32, i32
  }
  func.func @transform_4(%arg0: i32) -> (i32, i32) {
    %c0_i32 = arith.constant 0 : i32
    %c0_i32_0 = arith.constant 0 : i32
    %c0_i32_1 = arith.constant 0 : i32
    return %c0_i32, %c0_i32_0 : i32, i32
  }
  func.func @transform_5(%arg0: i32) -> (i32, i32) {
    %c0_i32 = arith.constant 0 : i32
    %c0_i32_0 = arith.constant 0 : i32
    return %arg0, %c0_i32 : i32, i32
  }
}

module attributes {stable_mosaic.version = 11 : i64} {
  func.func @mlp_kernel(%arg0: i32, %arg1: memref<16x128xf32, #tpu.memory_space<vmem>>, %arg2: memref<128x128xbf16, #tpu.memory_space<vmem>>, %arg3: memref<1x128xf32, #tpu.memory_space<vmem>>, %arg4: memref<128x128xbf16, #tpu.memory_space<vmem>>, %arg5: memref<1x128xf32, #tpu.memory_space<vmem>>, %arg6: memref<16x128xf32, #tpu.memory_space<vmem>>) attributes {dimension_semantics = [#tpu.dimension_semantics<parallel>], iteration_bounds = array<i64: 1>, scalar_prefetch = 0 : i64, scratch_operands = 0 : i64, tpu.core_type = #tpu.core_type<tc>, window_params = [{transform_indices = @transform_0, window_bounds = array<i64: 16, 128>}, {pipeline_mode = #tpu.pipeline_mode<synchronous>, transform_indices = @transform_1, window_bounds = array<i64: 128, 128>}, {pipeline_mode = #tpu.pipeline_mode<synchronous>, transform_indices = @transform_2, window_bounds = array<i64: 1, 128>}, {pipeline_mode = #tpu.pipeline_mode<synchronous>, transform_indices = @transform_3, window_bounds = array<i64: 128, 128>}, {pipeline_mode = #tpu.pipeline_mode<synchronous>, transform_indices = @transform_4, window_bounds = array<i64: 1, 128>}, {transform_indices = @transform_5, window_bounds = array<i64: 16, 128>}]} {
    %c0 = arith.constant 0 : index
    %c0_0 = arith.constant 0 : index
    %0 = vector.load %arg1[%c0, %c0_0] : memref<16x128xf32, #tpu.memory_space<vmem>>, vector<16x128xf32>
    %1 = arith.truncf %0 : vector<16x128xf32> to vector<16x128xbf16>
    %cst = arith.constant 0.000000e+00 : f32
    %2 = vector.broadcast %cst : f32 to vector<16x128xf32>
    %c0_1 = arith.constant 0 : index
    %c0_2 = arith.constant 0 : index
    %3 = vector.load %arg2[%c0_1, %c0_2] : memref<128x128xbf16, #tpu.memory_space<vmem>>, vector<128x128xbf16>
    %cst_3 = arith.constant dense<0.000000e+00> : vector<16x128xf32>
    %4 = tpu.matmul %1, %3, %cst_3 {dimension_numbers = #tpu.dot_dimension_numbers<[1], [0], [0], [1], [0, 0, 1, 1], [], []>} : vector<16x128xbf16>, vector<128x128xbf16>, vector<16x128xf32> -> vector<16x128xf32>
    %c0_4 = arith.constant 0 : index
    %c0_5 = arith.constant 0 : index
    %5 = vector.load %arg3[%c0_4, %c0_5] : memref<1x128xf32, #tpu.memory_space<vmem>>, vector<1x128xf32>
    %6 = vector.broadcast %5 : vector<1x128xf32> to vector<16x128xf32>
    %7 = arith.addf %4, %6 : vector<16x128xf32>
    %cst_6 = arith.constant 0.000000e+00 : f32
    %8 = vector.broadcast %cst_6 : f32 to vector<16x128xf32>
    %9 = arith.maximumf %7, %8 : vector<16x128xf32>
    %10 = arith.truncf %9 : vector<16x128xf32> to vector<16x128xbf16>
    %c0_7 = arith.constant 0 : index
    %c0_8 = arith.constant 0 : index
    %11 = vector.load %arg4[%c0_7, %c0_8] : memref<128x128xbf16, #tpu.memory_space<vmem>>, vector<128x128xbf16>
    %cst_9 = arith.constant dense<0.000000e+00> : vector<16x128xf32>
    %12 = tpu.matmul %10, %11, %cst_9 {dimension_numbers = #tpu.dot_dimension_numbers<[1], [0], [0], [1], [0, 0, 1, 1], [], []>} : vector<16x128xbf16>, vector<128x128xbf16>, vector<16x128xf32> -> vector<16x128xf32>
    %13 = arith.addf %2, %12 : vector<16x128xf32>
    %c0_10 = arith.constant 0 : index
    %c0_11 = arith.constant 0 : index
    %14 = vector.load %arg5[%c0_10, %c0_11] : memref<1x128xf32, #tpu.memory_space<vmem>>, vector<1x128xf32>
    %15 = vector.broadcast %14 : vector<1x128xf32> to vector<16x128xf32>
    %16 = arith.addf %13, %15 : vector<16x128xf32>
    %c0_12 = arith.constant 0 : index
    %c0_13 = arith.constant 0 : index
    %17 = vector.load %arg6[%c0_12, %c0_13] : memref<16x128xf32, #tpu.memory_space<vmem>>, vector<16x128xf32>
    tpu.vector_store %arg6[%c0_12, %c0_13], %16 {strides = array<i32>} : memref<16x128xf32, #tpu.memory_space<vmem>>, vector<16x128xf32>,
    return
  }
  func.func @transform_0(%arg0: i32) -> (i32, i32) {
    %c0_i32 = arith.constant 0 : i32
    %c0_i32_0 = arith.constant 0 : i32
    return %arg0, %c0_i32 : i32, i32
  }
  func.func @transform_1(%arg0: i32) -> (i32, i32) {
    %c0_i32 = arith.constant 0 : i32
    %c0_i32_0 = arith.constant 0 : i32
    %c0_i32_1 = arith.constant 0 : i32
    return %c0_i32, %c0_i32_0 : i32, i32
  }
  func.func @transform_2(%arg0: i32) -> (i32, i32) {
    %c0_i32 = arith.constant 0 : i32
    %c0_i32_0 = arith.constant 0 : i32
    %c0_i32_1 = arith.constant 0 : i32
    return %c0_i32, %c0_i32_0 : i32, i32
  }
  func.func @transform_3(%arg0: i32) -> (i32, i32) {
    %c0_i32 = arith.constant 0 : i32
    %c0_i32_0 = arith.constant 0 : i32
    %c0_i32_1 = arith.constant 0 : i32
    return %c0_i32, %c0_i32_0 : i32, i32
  }
  func.func @transform_4(%arg0: i32) -> (i32, i32) {
    %c0_i32 = arith.constant 0 : i32
    %c0_i32_0 = arith.constant 0 : i32
    %c0_i32_1 = arith.constant 0 : i32
    return %c0_i32, %c0_i32_0 : i32, i32
  }
  func.func @transform_5(%arg0: i32) -> (i32, i32) {
    %c0_i32 = arith.constant 0 : i32
    %c0_i32_0 = arith.constant 0 : i32
    return %arg0, %c0_i32 : i32, i32
  }
}

</mosaic_0001>

<bundles_post_ra>
// kernel: _mlp_call.1
= control target key start
LH: loop header
LB: loop body
LE: loop exit
PB: predicated region body
PF: predicated region fallthrough
CT: control target
= control target key end

     0   :  { %10 = vsyncpa [#allocation3], 0  ;;  %s511_s0 = inlined_call_operand.vmem [shape: f32[16,128], index: 0, kind: input, shape index: {}]   ;;  %s512_s1 = inlined_call_operand.hbm [shape: bf16[128,128], index: 1, kind: input, shape index: {}]   ;;  %s513_s2 = inlined_call_operand.vmem [shape: f32[1,128], index: 2, kind: input, shape index: {}]   ;;  %s514_s3 = inlined_call_operand.hbm [shape: bf16[128,128], index: 3, kind: input, shape index: {}]   ;;  %s515_s4 = inlined_call_operand.vmem [shape: f32[1,128], index: 4, kind: input, shape index: {}]   ;;  %s516_s5 = inlined_call_operand.vmem [shape: f32[16,128], index: 5, kind: output, shape index: {}]  }
   0x1   :  { %11 = vsyncpa [#allocation5], 0  ;;  %s433_s18 = smov [#allocation2]   ;;  %s385_s22 = scalar_lea.hbm %s512_s1, 1024 }
   0x2   :  { %s19_s19 = sshll.u32 %s433_s18, 4  ;;  %p386_p0 = scmp.ne.s32.totalorder %s512_s1, %s385_s22  ;;  %s20_s19 = int_to_ptr.vmem [resolvable:$true] %s19_s19 }
   0x3   :  { %p389_p1 = scmp.lt.u32.totalorder %s385_s22, %s512_s1 }
   0x5   :  { %p391_p2 = pnand %p389_p1, %p386_p0 }
   0x7   :  { %394 = shalt.err (!%p391_p2)
}
   0x8   :  { %s395_s27 = scalar_lea.vmem %s20_s19, 1024  ;;  %p400_p4 = scmp.lt.s32.totalorder %s20_s19, %s20_s19 }
   0x9   :  { %p396_p3 = scmp.ne.s32.totalorder %s20_s19, %s395_s27  ;;  %p401_p5 = scmp.lt.s32.totalorder %s395_s27, %s395_s27 }
   0xb   :  { %p402_p6 = por %p401_p5, %p400_p4 }
   0xd   :  { %p403_p7 = pnand %p402_p6, %p396_p3 }
   0xf   :  { %406 = shalt.err (!%p403_p7)
}
  0x10   :  { %s434_s28 = smov 64   ;;  %s435_s29 = smov 4  }
  0x11   :  { %25 = dma.hbm_to_vmem [thread:$0]  %s512_s1, 1024, %s20_s19, [#allocation3], %s434_s28, %s434_s28, %s435_s29  }
  0x12   :  { %s436_s7 = smov [#allocation4]   ;;  %s407_s11 = scalar_lea.hbm %s514_s3, 1024 }
  0x13   :  { %s33_s8 = sshll.u32 %s436_s7, 4  ;;  %p408_p8 = scmp.ne.s32.totalorder %s514_s3, %s407_s11  ;;  %s34_s8 = int_to_ptr.vmem [resolvable:$true] %s33_s8 }
  0x14   :  { %p411_p9 = scmp.lt.u32.totalorder %s407_s11, %s514_s3 }
  0x16   :  { %p413_p10 = pnand %p411_p9, %p408_p8 }
  0x18   :  { %416 = shalt.err (!%p413_p10)
}
  0x19   :  { %s417_s16 = scalar_lea.vmem %s34_s8, 1024  ;;  %p422_p12 = scmp.lt.s32.totalorder %s34_s8, %s34_s8 }
  0x1a   :  { %p418_p11 = scmp.ne.s32.totalorder %s34_s8, %s417_s16  ;;  %p423_p13 = scmp.lt.s32.totalorder %s417_s16, %s417_s16 }
  0x1c   :  { %p424_p0 = por %p423_p13, %p422_p12 }
  0x1e   :  { %p425_p1 = pnand %p424_p0, %p418_p11 }
  0x20   :  { %428 = shalt.err (!%p425_p1)
}
  0x21   :  { %39 = dma.hbm_to_vmem [thread:$0]  %s514_s3, 1024, %s34_s8, [#allocation5], %s434_s28, %s434_s28, %s435_s29  }
  0x22   :  { %429 = dma.done.wait [#allocation3], 1024  }
  0x23   :  { %430 = vsyncadd [#allocation3], 4294966272 }
  0x24   :  { %431 = dma.done.wait [#allocation5], 1024  }
  0x25   :  { %432 = vsyncadd [#allocation5], 4294966272  ;;  %v437_v0 = vmov 0.0   ;;  %vm438_vm0 = vmmov 0   ;;  %v369_v1 = vld [vmem:[#allocation2] sm:$0xff]   ;;  %v370_v2 = vld [vmem:[#allocation2 + $0x8] sm:$0xff]  }
  0x26   :  { %323 = vmatprep.subr.bf16.mxu0 %v437_v0  ;;  %339 = vmatprep.mubr.msk.bf16.mxu0 %vm438_vm0, %v437_v0  ;;  %v371_v3 = vld [vmem:[#allocation2 + $0x10] sm:$0xff]   ;;  %v377_v4 = vld [vmem:[#allocation4] sm:$0xff]   ;;  %v372_v5 = vld [vmem:[#allocation2 + $0x18] sm:$0xff]  }
  0x27   :  { %343 = vmatprep.subr.bf16.mxu1 %v437_v0  ;;  %359 = vmatprep.mubr.msk.bf16.mxu1 %vm438_vm0, %v437_v0  ;;  %v378_v6 = vld [vmem:[#allocation4 + $0x8] sm:$0xff]   ;;  %v373_v7 = vld [vmem:[#allocation2 + $0x20] sm:$0xff]   ;;  %v379_v8 = vld [vmem:[#allocation4 + $0x10] sm:$0xff]  }
  0x28   :  { %324 = vmatpush3.bf16.msra.mxu0 %v369_v1  ;;  %344 = vmatpush3.bf16.msra.mxu1 %v377_v4  ;;  %v374_v9 = vld [vmem:[#allocation2 + $0x28] sm:$0xff]   ;;  %v380_v10 = vld [vmem:[#allocation4 + $0x18] sm:$0xff]   ;;  %v375_v11 = vld [vmem:[#allocation2 + $0x30] sm:$0xff]  }
  0x29   :  { %325 = vmatprep.subr.bf16.mxu0 %v437_v0  ;;  %345 = vmatprep.subr.bf16.mxu1 %v437_v0  ;;  %v381_v12 = vld [vmem:[#allocation4 + $0x20] sm:$0xff]   ;;  %v376_v13 = vld [vmem:[#allocation2 + $0x38] sm:$0xff]   ;;  %v50_v15 = vld [vmem:[%s511_s0 + $0x8] sm:$0xff] }
  0x2a   :  { %v49_v14 = vld [vmem:[%s511_s0] sm:$0xff]  ;;  %v382_v16 = vld [vmem:[#allocation4 + $0x28] sm:$0xff]   ;;  %v383_v18 = vld [vmem:[#allocation4 + $0x30] sm:$0xff]  }
  0x2b   :  { %v51_v17 = vpack.c.bf16 %v50_v15, %v49_v14  ;;  %v384_v19 = vld [vmem:[#allocation4 + $0x38] sm:$0xff]   ;;  %v287_v20 = vld [vmem:[%s513_s2] ss:$0 sm:$0xff] }
  0x2c   :  { %326 = vmatpush3.bf16.msra.mxu0 %v370_v2  ;;  %346 = vmatpush3.bf16.msra.mxu1 %v378_v6  ;;  %v296_v30 = vld [vmem:[%s515_s4] ss:$0 sm:$0xff] }
  0x2d   :  { %327 = vmatprep.subr.bf16.mxu0 %v437_v0  ;;  %347 = vmatprep.subr.bf16.mxu1 %v437_v0 }
  0x30   :  { %328 = vmatpush3.bf16.msra.mxu0 %v371_v3  ;;  %348 = vmatpush3.bf16.msra.mxu1 %v379_v8 }
  0x31   :  { %329 = vmatprep.subr.bf16.mxu0 %v437_v0  ;;  %349 = vmatprep.subr.bf16.mxu1 %v437_v0 }
  0x34   :  { %330 = vmatpush3.bf16.msra.mxu0 %v372_v5  ;;  %350 = vmatpush3.bf16.msra.mxu1 %v380_v10 }
  0x35   :  { %331 = vmatprep.subr.bf16.mxu0 %v437_v0  ;;  %351 = vmatprep.subr.bf16.mxu1 %v437_v0 }
  0x38   :  { %332 = vmatpush3.bf16.msra.mxu0 %v373_v7  ;;  %352 = vmatpush3.bf16.msra.mxu1 %v381_v12 }
  0x39   :  { %333 = vmatprep.subr.bf16.mxu0 %v437_v0  ;;  %353 = vmatprep.subr.bf16.mxu1 %v437_v0 }
  0x3c   :  { %334 = vmatpush3.bf16.msra.mxu0 %v374_v9  ;;  %354 = vmatpush3.bf16.msra.mxu1 %v382_v16 }
  0x3d   :  { %335 = vmatprep.subr.bf16.mxu0 %v437_v0  ;;  %355 = vmatprep.subr.bf16.mxu1 %v437_v0 }
  0x40   :  { %336 = vmatpush3.bf16.msra.mxu0 %v375_v11  ;;  %356 = vmatpush3.bf16.msra.mxu1 %v383_v18 }
  0x41   :  { %337 = vmatprep.subr.bf16.mxu0 %v437_v0  ;;  %357 = vmatprep.subr.bf16.mxu1 %v437_v0 }
  0x44   :  { %338 = vmatpush3.bf16.msra.mxu0 %v376_v13  ;;  %358 = vmatpush3.bf16.msra.mxu1 %v384_v19 }
  0x47   :  { %340 = vmatmul.mubr.bf16.vlgmr.msra.gmra.mrb[0].mxu0 %v51_v17 }
 0x11a   :  { %v157_v21 = vpop.f32.mrb[0].mxu0 }
 0x11b   :  { %v158_v22 = vadd.f32 %v287_v20, %v157_v21  ;;  %v341_v23 = vpop.f32.mrb[1].mxu0 }
 0x11c   :  { %v160_v24 = vpop.f32.mrb[2].mxu0 }
 0x11d   :  { %v161_v25 = vadd.f32 %v287_v20, %v160_v24  ;;  %v342_v26 = vpop.f32.mrb[3].mxu0  ;;  %v164_v27 = vmax.f32 %v158_v22, 0.0 }
 0x11f   :  { %v165_v28 = vmax.f32 %v161_v25, 0.0 }
 0x121   :  { %v166_v29 = vpack.c.bf16 %v165_v28, %v164_v27 }
 0x123   :  { %360 = vmatmul.mubr.bf16.vlgmr.msra.gmra.mrb[0].mxu1 %v166_v29 }
 0x1f6   :  { %v272_v31 = vpop.f32.mrb[0].mxu1 }
 0x1f7   :  { %v273_v32 = vadd.f32 %v296_v30, %v272_v31  ;;  %v361_v33 = vpop.f32.mrb[1].mxu1 }
 0x1f8   :  { %v275_v34 = vpop.f32.mrb[2].mxu1 }
 0x1f9   :  { %279 = vst [vmem:[%s516_s5] sm:$0xff] %v273_v32  ;;  %v276_v35 = vadd.f32 %v296_v30, %v275_v34  ;;  %v362_v36 = vpop.f32.mrb[3].mxu1 }
 0x1fb   :  { %280 = vst [vmem:[%s516_s5 + $0x8] sm:$0xff] %v276_v35 }
 0x1fc   :  { %285 = vsyncpa [#allocation3], 1 }
 0x1fd   :  { %286 = vsyncpa [#allocation5], 1 }

// kernel: _mlp_call.1
= control target key start
LH: loop header
LB: loop body
LE: loop exit
PB: predicated region body
PF: predicated region fallthrough
CT: control target
= control target key end

     0   :  { %10 = vsyncpa [#allocation3], 0  ;;  %s511_s0 = inlined_call_operand.vmem [shape: f32[16,128], index: 0, kind: input, shape index: {}]   ;;  %s512_s1 = inlined_call_operand.hbm [shape: bf16[128,128], index: 1, kind: input, shape index: {}]   ;;  %s513_s2 = inlined_call_operand.vmem [shape: f32[1,128], index: 2, kind: input, shape index: {}]   ;;  %s514_s3 = inlined_call_operand.hbm [shape: bf16[128,128], index: 3, kind: input, shape index: {}]   ;;  %s515_s4 = inlined_call_operand.vmem [shape: f32[1,128], index: 4, kind: input, shape index: {}]   ;;  %s516_s5 = inlined_call_operand.vmem [shape: f32[16,128], index: 5, kind: output, shape index: {}]  }
   0x1   :  { %11 = vsyncpa [#allocation5], 0  ;;  %s433_s18 = smov [#allocation2]   ;;  %s385_s22 = scalar_lea.hbm %s512_s1, 1024 }
   0x2   :  { %s19_s19 = sshll.u32 %s433_s18, 4  ;;  %p386_p0 = scmp.ne.s32.totalorder %s512_s1, %s385_s22  ;;  %s20_s19 = int_to_ptr.vmem [resolvable:$true] %s19_s19 }
   0x3   :  { %p389_p1 = scmp.lt.u32.totalorder %s385_s22, %s512_s1 }
   0x5   :  { %p391_p2 = pnand %p389_p1, %p386_p0 }
   0x7   :  { %394 = shalt.err (!%p391_p2)
}
   0x8   :  { %s395_s27 = scalar_lea.vmem %s20_s19, 1024  ;;  %p400_p4 = scmp.lt.s32.totalorder %s20_s19, %s20_s19 }
   0x9   :  { %p396_p3 = scmp.ne.s32.totalorder %s20_s19, %s395_s27  ;;  %p401_p5 = scmp.lt.s32.totalorder %s395_s27, %s395_s27 }
   0xb   :  { %p402_p6 = por %p401_p5, %p400_p4 }
   0xd   :  { %p403_p7 = pnand %p402_p6, %p396_p3 }
   0xf   :  { %406 = shalt.err (!%p403_p7)
}
  0x10   :  { %s434_s28 = smov 64   ;;  %s435_s29 = smov 4  }
  0x11   :  { %25 = dma.hbm_to_vmem [thread:$0]  %s512_s1, 1024, %s20_s19, [#allocation3], %s434_s28, %s434_s28, %s435_s29  }
  0x12   :  { %s436_s7 = smov [#allocation4]   ;;  %s407_s11 = scalar_lea.hbm %s514_s3, 1024 }
  0x13   :  { %s33_s8 = sshll.u32 %s436_s7, 4  ;;  %p408_p8 = scmp.ne.s32.totalorder %s514_s3, %s407_s11  ;;  %s34_s8 = int_to_ptr.vmem [resolvable:$true] %s33_s8 }
  0x14   :  { %p411_p9 = scmp.lt.u32.totalorder %s407_s11, %s514_s3 }
  0x16   :  { %p413_p10 = pnand %p411_p9, %p408_p8 }
  0x18   :  { %416 = shalt.err (!%p413_p10)
}
  0x19   :  { %s417_s16 = scalar_lea.vmem %s34_s8, 1024  ;;  %p422_p12 = scmp.lt.s32.totalorder %s34_s8, %s34_s8 }
  0x1a   :  { %p418_p11 = scmp.ne.s32.totalorder %s34_s8, %s417_s16  ;;  %p423_p13 = scmp.lt.s32.totalorder %s417_s16, %s417_s16 }
  0x1c   :  { %p424_p0 = por %p423_p13, %p422_p12 }
  0x1e   :  { %p425_p1 = pnand %p424_p0, %p418_p11 }
  0x20   :  { %428 = shalt.err (!%p425_p1)
}
  0x21   :  { %39 = dma.hbm_to_vmem [thread:$0]  %s514_s3, 1024, %s34_s8, [#allocation5], %s434_s28, %s434_s28, %s435_s29  }
  0x22   :  { %429 = dma.done.wait [#allocation3], 1024  }
  0x23   :  { %430 = vsyncadd [#allocation3], 4294966272 }
  0x24   :  { %431 = dma.done.wait [#allocation5], 1024  }
  0x25   :  { %432 = vsyncadd [#allocation5], 4294966272  ;;  %v437_v0 = vmov 0.0   ;;  %vm438_vm0 = vmmov 0   ;;  %v369_v1 = vld [vmem:[#allocation2] sm:$0xff]   ;;  %v370_v2 = vld [vmem:[#allocation2 + $0x8] sm:$0xff]  }
  0x26   :  { %323 = vmatprep.subr.bf16.mxu0 %v437_v0  ;;  %339 = vmatprep.mubr.msk.bf16.mxu0 %vm438_vm0, %v437_v0  ;;  %v371_v3 = vld [vmem:[#allocation2 + $0x10] sm:$0xff]   ;;  %v377_v4 = vld [vmem:[#allocation4] sm:$0xff]   ;;  %v372_v5 = vld [vmem:[#allocation2 + $0x18] sm:$0xff]  }
  0x27   :  { %343 = vmatprep.subr.bf16.mxu1 %v437_v0  ;;  %359 = vmatprep.mubr.msk.bf16.mxu1 %vm438_vm0, %v437_v0  ;;  %v378_v6 = vld [vmem:[#allocation4 + $0x8] sm:$0xff]   ;;  %v373_v7 = vld [vmem:[#allocation2 + $0x20] sm:$0xff]   ;;  %v379_v8 = vld [vmem:[#allocation4 + $0x10] sm:$0xff]  }
  0x28   :  { %324 = vmatpush3.bf16.msra.mxu0 %v369_v1  ;;  %344 = vmatpush3.bf16.msra.mxu1 %v377_v4  ;;  %v374_v9 = vld [vmem:[#allocation2 + $0x28] sm:$0xff]   ;;  %v380_v10 = vld [vmem:[#allocation4 + $0x18] sm:$0xff]   ;;  %v375_v11 = vld [vmem:[#allocation2 + $0x30] sm:$0xff]  }
  0x29   :  { %325 = vmatprep.subr.bf16.mxu0 %v437_v0  ;;  %345 = vmatprep.subr.bf16.mxu1 %v437_v0  ;;  %v381_v12 = vld [vmem:[#allocation4 + $0x20] sm:$0xff]   ;;  %v376_v13 = vld [vmem:[#allocation2 + $0x38] sm:$0xff]   ;;  %v50_v15 = vld [vmem:[%s511_s0 + $0x8] sm:$0xff] }
  0x2a   :  { %v49_v14 = vld [vmem:[%s511_s0] sm:$0xff]  ;;  %v382_v16 = vld [vmem:[#allocation4 + $0x28] sm:$0xff]   ;;  %v383_v18 = vld [vmem:[#allocation4 + $0x30] sm:$0xff]  }
  0x2b   :  { %v51_v17 = vpack.c.bf16 %v50_v15, %v49_v14  ;;  %v384_v19 = vld [vmem:[#allocation4 + $0x38] sm:$0xff]   ;;  %v287_v20 = vld [vmem:[%s513_s2] ss:$0 sm:$0xff] }
  0x2c   :  { %326 = vmatpush3.bf16.msra.mxu0 %v370_v2  ;;  %346 = vmatpush3.bf16.msra.mxu1 %v378_v6  ;;  %v296_v30 = vld [vmem:[%s515_s4] ss:$0 sm:$0xff] }
  0x2d   :  { %327 = vmatprep.subr.bf16.mxu0 %v437_v0  ;;  %347 = vmatprep.subr.bf16.mxu1 %v437_v0 }
  0x30   :  { %328 = vmatpush3.bf16.msra.mxu0 %v371_v3  ;;  %348 = vmatpush3.bf16.msra.mxu1 %v379_v8 }
  0x31   :  { %329 = vmatprep.subr.bf16.mxu0 %v437_v0  ;;  %349 = vmatprep.subr.bf16.mxu1 %v437_v0 }
  0x34   :  { %330 = vmatpush3.bf16.msra.mxu0 %v372_v5  ;;  %350 = vmatpush3.bf16.msra.mxu1 %v380_v10 }
  0x35   :  { %331 = vmatprep.subr.bf16.mxu0 %v437_v0  ;;  %351 = vmatprep.subr.bf16.mxu1 %v437_v0 }
  0x38   :  { %332 = vmatpush3.bf16.msra.mxu0 %v373_v7  ;;  %352 = vmatpush3.bf16.msra.mxu1 %v381_v12 }
  0x39   :  { %333 = vmatprep.subr.bf16.mxu0 %v437_v0  ;;  %353 = vmatprep.subr.bf16.mxu1 %v437_v0 }
  0x3c   :  { %334 = vmatpush3.bf16.msra.mxu0 %v374_v9  ;;  %354 = vmatpush3.bf16.msra.mxu1 %v382_v16 }
  0x3d   :  { %335 = vmatprep.subr.bf16.mxu0 %v437_v0  ;;  %355 = vmatprep.subr.bf16.mxu1 %v437_v0 }
  0x40   :  { %336 = vmatpush3.bf16.msra.mxu0 %v375_v11  ;;  %356 = vmatpush3.bf16.msra.mxu1 %v383_v18 }
  0x41   :  { %337 = vmatprep.subr.bf16.mxu0 %v437_v0  ;;  %357 = vmatprep.subr.bf16.mxu1 %v437_v0 }
  0x44   :  { %338 = vmatpush3.bf16.msra.mxu0 %v376_v13  ;;  %358 = vmatpush3.bf16.msra.mxu1 %v384_v19 }
  0x47   :  { %340 = vmatmul.mubr.bf16.vlgmr.msra.gmra.mrb[0].mxu0 %v51_v17 }
 0x11a   :  { %v157_v21 = vpop.f32.mrb[0].mxu0 }
 0x11b   :  { %v158_v22 = vadd.f32 %v287_v20, %v157_v21  ;;  %v341_v23 = vpop.f32.mrb[1].mxu0 }
 0x11c   :  { %v160_v24 = vpop.f32.mrb[2].mxu0 }
 0x11d   :  { %v161_v25 = vadd.f32 %v287_v20, %v160_v24  ;;  %v342_v26 = vpop.f32.mrb[3].mxu0  ;;  %v164_v27 = vmax.f32 %v158_v22, 0.0 }
 0x11f   :  { %v165_v28 = vmax.f32 %v161_v25, 0.0 }
 0x121   :  { %v166_v29 = vpack.c.bf16 %v165_v28, %v164_v27 }
 0x123   :  { %360 = vmatmul.mubr.bf16.vlgmr.msra.gmra.mrb[0].mxu1 %v166_v29 }
 0x1f6   :  { %v272_v31 = vpop.f32.mrb[0].mxu1 }
 0x1f7   :  { %v273_v32 = vadd.f32 %v296_v30, %v272_v31  ;;  %v361_v33 = vpop.f32.mrb[1].mxu1 }
 0x1f8   :  { %v275_v34 = vpop.f32.mrb[2].mxu1 }
 0x1f9   :  { %279 = vst [vmem:[%s516_s5] sm:$0xff] %v273_v32  ;;  %v276_v35 = vadd.f32 %v296_v30, %v275_v34  ;;  %v362_v36 = vpop.f32.mrb[3].mxu1 }
 0x1fb   :  { %280 = vst [vmem:[%s516_s5 + $0x8] sm:$0xff] %v276_v35 }
 0x1fc   :  { %285 = vsyncpa [#allocation3], 1 }
 0x1fd   :  { %286 = vsyncpa [#allocation5], 1 }

</bundles_post_ra>
